<compile_context>
chip_gen: v7x
topology: tpu7x:2x2x1
jax: 0.10.0
libtpu: 0.0.40
codegen_flags: <defaults>
</compile_context>

<pallas_src>
import functools

import jax
import jax.numpy as jnp
from jax import lax
from jax.experimental import pallas as pl
from jax.experimental.pallas import tpu as pltpu

EMBED_DIMS = 32
NUM_HEADS = 2
WINDOW_SIZE = 7


# ----------------------------------------------------------------------------
# fused Pallas kernel: WindowMSA over all windows of one image
# ----------------------------------------------------------------------------
def _swmsa_kernel(q_ref, kv_ref, wqkv_ref, bqkv_ref, wo_ref, bo_ref,
                  rel_ref, mask_ref, o_ref, qp_ref, kvp_ref, att_ref, *,
                  num_heads, head_dim, num_windows, nq, nk):
    """q_ref: (1, nW*nq, C); kv_ref: (1, nW*nk, C); rel_ref: (heads, nq, nk);
    mask_ref: (nW, nq, nk).  nq/nk are the padded per-window sizes."""
    C = num_heads * head_dim

    # Hoisted projections over ALL windows at once (bf16 MXU operands, f32 acc),
    # staged into VMEM scratch.  wqkv = [wq*scale | wkv]; scale folded at call site.
    qp_ref[...] = (jnp.dot(q_ref[0].astype(jnp.bfloat16), wqkv_ref[:, :C],
                           preferred_element_type=jnp.float32) + bqkv_ref[:, :C])
    kvp_ref[...] = (jnp.dot(kv_ref[0].astype(jnp.bfloat16), wqkv_ref[:, C:],
                            preferred_element_type=jnp.float32) + bqkv_ref[:, C:])

    # Per-head attention, batched over all windows with a single dot_general
    # pair (QK^T and PV).  Only 2 head iterations -> the 16-lane head slices
    # happen once per image, not per window.
    for h in range(num_heads):
        lo = h * head_dim
        qh = qp_ref[:, lo:lo + head_dim].reshape(num_windows, nq, head_dim)
        kh = kvp_ref[:, lo:lo + head_dim].reshape(num_windows, nk, head_dim)
        vh = kvp_ref[:, C + lo:C + lo + head_dim].reshape(num_windows, nk, head_dim)

        s = lax.dot_general(qh.astype(jnp.bfloat16), kh.astype(jnp.bfloat16),
                            (((2,), (2,)), ((0,), (0,))),
                            preferred_element_type=jnp.float32)        # (nW, nq, nk)
        s = s + rel_ref[h][None] + mask_ref[...]                       # rel-pos + shift mask
        s = s - jnp.max(s, axis=-1, keepdims=True)                     # full-lane reduction
        p = jnp.exp(s)
        p = p * pl.reciprocal(jnp.sum(p, axis=-1, keepdims=True), approx=True)

        oh = lax.dot_general(p.astype(jnp.bfloat16), vh.astype(jnp.bfloat16),
                             (((2,), (1,)), ((0,), (0,))),
                             preferred_element_type=jnp.float32)       # (nW, nq, hd)
        att_ref[:, lo:lo + head_dim] = oh.reshape(num_windows * nq, head_dim)

    # Single full-width output projection over all windows/heads.
    o = (jnp.dot(att_ref[...].astype(jnp.bfloat16), wo_ref[...],
                 preferred_element_type=jnp.float32) + bo_ref[...])
    o_ref[0] = o.astype(o_ref.dtype)


def wmsa_pallas(q_tok, kv_tok, rel_bias_p, mask_p, params):
    """q_tok: (B, nW*nq, C); kv_tok: (B, nW*nk, C); rel_bias_p: (heads, nq, nk);
    mask_p: (nW, nq, nk).  nq/nk already padded to (8,128)-aligned sizes."""
    B, LQ, C = q_tok.shape
    _, LK, _ = kv_tok.shape
    heads, nq, nk = rel_bias_p.shape
    nW = mask_p.shape[0]
    hd = C // heads
    scale = float(hd) ** -0.5

    # Pack [wq*scale | wkv] as bf16 (MXU operands); biases stay f32.
    wqkv = jnp.concatenate([params['wq'] * scale, params['wkv']],
                           axis=1).astype(jnp.bfloat16)                 # (C, 3C)
    bqkv = jnp.concatenate([params['bq'] * scale, params['bkv']], axis=1)  # (1, 3C)
    wo = params['wo'].astype(jnp.bfloat16)                              # (C, C)

    kern = functools.partial(_swmsa_kernel, num_heads=heads, head_dim=hd,
                             num_windows=nW, nq=nq, nk=nk)
    return pl.pallas_call(
        kern,
        out_shape=jax.ShapeDtypeStruct((B, LQ, C), jnp.float32),
        grid=(B,),
        in_specs=[
            pl.BlockSpec((1, LQ, C), lambda b: (b, 0, 0)),
            pl.BlockSpec((1, LK, C), lambda b: (b, 0, 0)),
            pl.BlockSpec((C, 3 * C), lambda b: (0, 0)),
            pl.BlockSpec((1, 3 * C), lambda b: (0, 0)),
            pl.BlockSpec((C, C), lambda b: (0, 0)),
            pl.BlockSpec((1, C), lambda b: (0, 0)),
            pl.BlockSpec((heads, nq, nk), lambda b: (0, 0, 0)),
            pl.BlockSpec((nW, nq, nk), lambda b: (0, 0, 0)),
        ],
        out_specs=pl.BlockSpec((1, LQ, C), lambda b: (b, 0, 0)),
        scratch_shapes=[pltpu.VMEM((LQ, C), jnp.float32),       # staged q projection
                        pltpu.VMEM((LK, 2 * C), jnp.float32),   # staged kv projection
                        pltpu.VMEM((LQ, C), jnp.float32)],      # attention output slab
        compiler_params=pltpu.CompilerParams(
            dimension_semantics=("parallel",)),   # v7x: shard batch over both TCs
    )(q_tok, kv_tok, wqkv, bqkv, wo, params['bo'], rel_bias_p, mask_p)


# ----------------------------------------------------------------------------
# pure-JAX reference of the same attention (for correctness check only)
# ----------------------------------------------------------------------------
def wmsa_reference(q_tok, kv_tok, rel_bias_p, mask_p, params):
    B, LQ, C = q_tok.shape
    heads, nq, nk = rel_bias_p.shape
    nW = mask_p.shape[0]
    hd = C // heads
    scale = float(hd) ** -0.5
    qp = q_tok @ params['wq'] + params['bq']                    # (B, LQ, C)
    kvp = kv_tok @ params['wkv'] + params['bkv']                # (B, LK, 2C)
    qh = qp.reshape(B, nW, nq, heads, hd).transpose(0, 1, 3, 2, 4) * scale
    kh = kvp[..., :C].reshape(B, nW, nk, heads, hd).transpose(0, 1, 3, 2, 4)
    vh = kvp[..., C:].reshape(B, nW, nk, heads, hd).transpose(0, 1, 3, 2, 4)
    att = jnp.einsum('bwhnd,bwhkd->bwhnk', qh, kh)
    att = att + rel_bias_p[None, None] + mask_p[None, :, None]
    att = jax.nn.softmax(att, axis=-1)
    o = jnp.einsum('bwhnk,bwhkd->bwhnd', att, vh)
    o = o.transpose(0, 1, 3, 2, 4).reshape(B, LQ, C)
    return o @ params['wo'] + params['bo']


# ----------------------------------------------------------------------------
# plain-JAX glue: relative-position bias, shift mask, window partition/reverse
# (pure layout / gather work, no compute)
# ----------------------------------------------------------------------------
def _relative_position_bias(table, ws):
    """WindowMSA.double_step_seq + flip(1) + gather -> (heads, N, N)."""
    seq1 = jnp.arange(0, (2 * ws - 1) * ws, 2 * ws - 1)
    seq2 = jnp.arange(0, ws)
    rel = (seq1[:, None] + seq2[None, :]).reshape(1, -1)
    idx = rel + rel.T
    idx = idx[:, ::-1]
    bias = table[idx.reshape(-1)].reshape(ws * ws, ws * ws, -1)
    return jnp.transpose(bias, (2, 0, 1)).astype(jnp.float32)


def _shift_attn_mask(H_pad, W_pad, ws, shift, nf):
    """Swin attention mask for the shifted-window path -> (nW, N, nf*N)."""
    hh = jnp.arange(H_pad)
    ww = jnp.arange(W_pad)
    h_reg = (hh >= H_pad - ws).astype(jnp.int32) + (hh >= H_pad - shift).astype(jnp.int32)
    w_reg = (ww >= W_pad - ws).astype(jnp.int32) + (ww >= W_pad - shift).astype(jnp.int32)
    img = (h_reg[:, None] * 3 + w_reg[None, :]).astype(jnp.float32)     # (H_pad, W_pad)
    nh, nw = H_pad // ws, W_pad // ws
    mw = img.reshape(nh, ws, nw, ws).transpose(0, 2, 1, 3).reshape(nh * nw, ws * ws)
    diff = mw[:, None, :] - mw[:, :, None]
    mask = jnp.where(diff != 0, jnp.float32(-100.0), jnp.float32(0.0))
    return jnp.tile(mask, (1, 1, nf))


def _round_up(x, m):
    return ((x + m - 1) // m) * m


def shift_window_msa_forward(q, kv, params, *, hw_shape, shift_size=0,
                             use_pallas=True):
    """ShiftWindowMSA.forward: q (B, L, C), kv (B, nf, L, C) -> (x, None, None)."""
    B, L, C = q.shape
    H, W = hw_shape
    assert L == H * W, 'input feature has wrong size'
    nf = kv.shape[1]
    ws = WINDOW_SIZE

    query = q.reshape(B, H, W, C)
    kvr = kv.reshape(B * nf, H, W, C)

    pad_r = (ws - W % ws) % ws
    pad_b = (ws - H % ws) % ws
    query = jnp.pad(query, ((0, 0), (0, pad_b), (0, pad_r), (0, 0)))
    kvr = jnp.pad(kvr, ((0, 0), (0, pad_b), (0, pad_r), (0, 0)))
    H_pad, W_pad = query.shape[1], query.shape[2]
    nh, nw = H_pad // ws, W_pad // ws
    nW, N, Nk = nh * nw, ws * ws, nf * ws * ws
    Nq_pad = _round_up(N, 8)        # 49 -> 56 (sublane aligned)
    Nk_pad = _round_up(Nk, 128)     # 98 -> 128 (lane aligned)

    if shift_size > 0:
        query = jnp.roll(query, (-shift_size, -shift_size), axis=(1, 2))
        kvr = jnp.roll(kvr, (-shift_size, -shift_size), axis=(1, 2))
        attn_mask = _shift_attn_mask(H_pad, W_pad, ws, shift_size, nf)
    else:
        attn_mask = jnp.zeros((nW, N, Nk), jnp.float32)

    # window partition: tokens ordered (window, w1, w2) for q; (window, nf, w1, w2)
    # for kv, then per-window padding to (Nq_pad / Nk_pad) with zero rows.
    q_win = (query.reshape(B, nh, ws, nw, ws, C)
             .transpose(0, 1, 3, 2, 4, 5).reshape(B, nW, N, C))
    q_tok = jnp.pad(q_win, ((0, 0), (0, 0), (0, Nq_pad - N), (0, 0))
                    ).reshape(B, nW * Nq_pad, C)
    kv_win = (kvr.reshape(B, nf, nh, ws, nw, ws, C)
              .transpose(0, 2, 4, 1, 3, 5, 6).reshape(B, nW, Nk, C))
    kv_tok = jnp.pad(kv_win, ((0, 0), (0, 0), (0, Nk_pad - Nk), (0, 0))
                     ).reshape(B, nW * Nk_pad, C)

    # relative-position bias (heads, N, N) -> tile over frames -> pad:
    #   padded query rows get 0 (finite, dropped later),
    #   padded key columns get -1e9 (finite -> no inf-inf NaN, kills softmax weight).
    rel_bias = _relative_position_bias(params['rpb_table'], ws)        # (heads, N, N)
    rel_bias = jnp.tile(rel_bias, (1, 1, nf))                          # (heads, N, Nk)
    rel_bias_p = jnp.pad(rel_bias, ((0, 0), (0, Nq_pad - N), (0, 0)))
    rel_bias_p = jnp.concatenate(
        [rel_bias_p,
         jnp.full((rel_bias.shape[0], Nq_pad, Nk_pad - Nk), -1e9, jnp.float32)],
        axis=-1)                                                       # (heads, Nq_pad, Nk_pad)
    mask_p = jnp.pad(attn_mask, ((0, 0), (0, Nq_pad - N), (0, Nk_pad - Nk)))

    attn_fn = wmsa_pallas if use_pallas else wmsa_reference
    out_tok = attn_fn(q_tok, kv_tok, rel_bias_p, mask_p, params)       # (B, nW*Nq_pad, C)

    # window reverse: drop padded query rows, then (+ roll back, crop padding)
    out_win = out_tok.reshape(B, nW, Nq_pad, C)[:, :, :N, :]
    x = (out_win.reshape(B, nh, nw, ws, ws, C)
         .transpose(0, 1, 3, 2, 4, 5).reshape(B, H_pad, W_pad, C))
    if shift_size > 0:
        x = jnp.roll(x, (shift_size, shift_size), axis=(1, 2))
    x = x[:, :H, :W, :].reshape(B, H * W, C)
    # TODO(synk): attn_drop / proj_drop are identity at the module's default 0.0 rates.
    return x, None, None


# ----------------------------------------------------------------------------
# parameters (deterministic random init; torch Linear stores W^T of ours)
# ----------------------------------------------------------------------------
def init_params(key):
    C = EMBED_DIMS
    ws = WINDOW_SIZE
    ks = jax.random.split(key, 7)

    def lin_w(k, fan_in, fan_out):
        bound = 1.0 / jnp.sqrt(jnp.float32(fan_in))
        return jax.random.uniform(k, (fan_in, fan_out), jnp.float32, -bound, bound)

    def lin_b(k, fan_in, fan_out):
        bound = 1.0 / jnp.sqrt(jnp.float32(fan_in))
        return jax.random.uniform(k, (1, fan_out), jnp.float32, -bound, bound)

    return dict(
        wq=lin_w(ks[0], C, C), bq=lin_b(ks[1], C, C),
        wkv=lin_w(ks[2], C, 2 * C), bkv=lin_b(ks[3], C, 2 * C),
        wo=lin_w(ks[4], C, C), bo=lin_b(ks[5], C, C),
        rpb_table=0.02 * jax.random.truncated_normal(
            ks[6], -2.0, 2.0, ((2 * ws - 1) * (2 * ws - 1), NUM_HEADS), jnp.float32),
    )


if __name__ == "__main__":
    key = jax.random.PRNGKey(0)
    kq, kkv, kp = jax.random.split(key, 3)
    B, C, H, W, NF = 2, EMBED_DIMS, 14, 14, 2
    q = jax.random.normal(kq, (B, H * W, C), jnp.float32)
    kv = jax.random.normal(kkv, (B, NF, H * W, C), jnp.float32)
    params = init_params(kp)

    fwd = jax.jit(shift_window_msa_forward,
                  static_argnames=('hw_shape', 'shift_size', 'use_pallas'))

    # Tolerance note: the kernel uses bf16 MXU operands (f32 accumulation) and
    # an approximate EUP reciprocal for the softmax denominator, so it is not
    # bit-identical to the f32 reference; 5e-2 max-abs bounds that comfortably.
    TOL = 5e-2

    # regular window MSA path (shift_size = 0)
    out, _, _ = fwd(q, kv, params, hw_shape=(H, W), shift_size=0, use_pallas=True)
    jax.block_until_ready(out)
    ref, _, _ = fwd(q, kv, params, hw_shape=(H, W), shift_size=0, use_pallas=False)
    assert out.shape == (B, H * W, C)
    assert bool(jnp.all(jnp.isfinite(out)))
    err = float(jnp.max(jnp.abs(out - ref)))
    assert err < TOL, f"mismatch vs reference (shift=0): {err}"

    # shifted-window path (cyclic shift + attention mask)
    out_s, _, _ = fwd(q, kv, params, hw_shape=(H, W), shift_size=3, use_pallas=True)
    ref_s, _, _ = fwd(q, kv, params, hw_shape=(H, W), shift_size=3, use_pallas=False)
    jax.block_until_ready(out_s)
    assert bool(jnp.all(jnp.isfinite(out_s)))
    err_s = float(jnp.max(jnp.abs(out_s - ref_s)))
    assert err_s < TOL, f"mismatch vs reference (shift=3): {err_s}"

    print("KERNEL_OK")
</pallas_src>

<mosaic_0001>
module attributes {stable_mosaic.version = 11 : i64} {
  func.func @_swmsa_kernel(%arg0: i32, %arg1: memref<1x224x32xf32, #tpu.memory_space<vmem>>, %arg2: memref<1x512x32xf32, #tpu.memory_space<vmem>>, %arg3: memref<32x96xbf16, #tpu.memory_space<vmem>>, %arg4: memref<1x96xf32, #tpu.memory_space<vmem>>, %arg5: memref<32x32xbf16, #tpu.memory_space<vmem>>, %arg6: memref<1x32xf32, #tpu.memory_space<vmem>>, %arg7: memref<2x56x128xf32, #tpu.memory_space<vmem>>, %arg8: memref<4x56x128xf32, #tpu.memory_space<vmem>>, %arg9: memref<1x224x32xf32, #tpu.memory_space<vmem>>, %arg10: memref<224x32xf32, #tpu.memory_space<vmem>>, %arg11: memref<512x64xf32, #tpu.memory_space<vmem>>, %arg12: memref<224x32xf32, #tpu.memory_space<vmem>>) attributes {dimension_semantics = [#tpu.dimension_semantics<parallel>], iteration_bounds = array<i64: 2>, scalar_prefetch = 0 : i64, scratch_operands = 3 : i64, tpu.core_type = #tpu.core_type<tc>, window_params = [{transform_indices = @transform_0, window_bounds = array<i64: 1, 224, 32>}, {transform_indices = @transform_1, window_bounds = array<i64: 1, 512, 32>}, {pipeline_mode = #tpu.pipeline_mode<synchronous>, transform_indices = @transform_2, window_bounds = array<i64: 32, 96>}, {pipeline_mode = #tpu.pipeline_mode<synchronous>, transform_indices = @transform_3, window_bounds = array<i64: 1, 96>}, {pipeline_mode = #tpu.pipeline_mode<synchronous>, transform_indices = @transform_4, window_bounds = array<i64: 32, 32>}, {pipeline_mode = #tpu.pipeline_mode<synchronous>, transform_indices = @transform_5, window_bounds = array<i64: 1, 32>}, {pipeline_mode = #tpu.pipeline_mode<synchronous>, transform_indices = @transform_6, window_bounds = array<i64: 2, 56, 128>}, {pipeline_mode = #tpu.pipeline_mode<synchronous>, transform_indices = @transform_7, window_bounds = array<i64: 4, 56, 128>}, {transform_indices = @transform_8, window_bounds = array<i64: 1, 224, 32>}]} {
    %c0 = arith.constant 0 : index
    %c0_0 = arith.constant 0 : index
    %c0_1 = arith.constant 0 : index
    %0 = vector.load %arg1[%c0, %c0_0, %c0_1] : memref<1x224x32xf32, #tpu.memory_space<vmem>>, vector<1x224x32xf32>
    %1 = vector.shape_cast %0 : vector<1x224x32xf32> to vector<224x32xf32>
    %2 = arith.truncf %1 : vector<224x32xf32> to vector<224x32xbf16>
    %c0_2 = arith.constant 0 : index
    %c0_3 = arith.constant 0 : index
    %3 = vector.load %arg3[%c0_2, %c0_3] : memref<32x96xbf16, #tpu.memory_space<vmem>>, vector<32x32xbf16>
    %cst = arith.constant dense<0.000000e+00> : vector<224x32xf32>
    %4 = tpu.matmul %2, %3, %cst {dimension_numbers = #tpu.dot_dimension_numbers<[1], [0], [0], [1], [0, 0, 1, 1], [], []>} : vector<224x32xbf16>, vector<32x32xbf16>, vector<224x32xf32> -> vector<224x32xf32>
    %c0_4 = arith.constant 0 : index
    %c0_5 = arith.constant 0 : index
    %5 = vector.load %arg4[%c0_4, %c0_5] : memref<1x96xf32, #tpu.memory_space<vmem>>, vector<1x32xf32>
    %6 = vector.broadcast %5 : vector<1x32xf32> to vector<224x32xf32>
    %7 = arith.addf %4, %6 : vector<224x32xf32>
    %c0_6 = arith.constant 0 : index
    %c0_7 = arith.constant 0 : index
    %8 = vector.load %arg10[%c0_6, %c0_7] : memref<224x32xf32, #tpu.memory_space<vmem>>, vector<224x32xf32>
    tpu.vector_store %arg10[%c0_6, %c0_7], %7 {strides = array<i32>} : memref<224x32xf32, #tpu.memory_space<vmem>>, vector<224x32xf32>,
    %c0_8 = arith.constant 0 : index
    %c0_9 = arith.constant 0 : index
    %c0_10 = arith.constant 0 : index
    %9 = vector.load %arg2[%c0_8, %c0_9, %c0_10] : memref<1x512x32xf32, #tpu.memory_space<vmem>>, vector<1x512x32xf32>
    %10 = vector.shape_cast %9 : vector<1x512x32xf32> to vector<512x32xf32>
    %11 = arith.truncf %10 : vector<512x32xf32> to vector<512x32xbf16>
    %c0_11 = arith.constant 0 : index
    %c32 = arith.constant 32 : index
    %12 = vector.load %arg3[%c0_11, %c32] : memref<32x96xbf16, #tpu.memory_space<vmem>>, vector<32x64xbf16>
    %cst_12 = arith.constant dense<0.000000e+00> : vector<512x64xf32>
    %13 = tpu.matmul %11, %12, %cst_12 {dimension_numbers = #tpu.dot_dimension_numbers<[1], [0], [0], [1], [0, 0, 1, 1], [], []>} : vector<512x32xbf16>, vector<32x64xbf16>, vector<512x64xf32> -> vector<512x64xf32>
    %c0_13 = arith.constant 0 : index
    %c32_14 = arith.constant 32 : index
    %14 = vector.load %arg4[%c0_13, %c32_14] : memref<1x96xf32, #tpu.memory_space<vmem>>, vector<1x64xf32>
    %15 = vector.broadcast %14 : vector<1x64xf32> to vector<512x64xf32>
    %16 = arith.addf %13, %15 : vector<512x64xf32>
    %c0_15 = arith.constant 0 : index
    %c0_16 = arith.constant 0 : index
    %17 = vector.load %arg11[%c0_15, %c0_16] : memref<512x64xf32, #tpu.memory_space<vmem>>, vector<512x64xf32>
    tpu.vector_store %arg11[%c0_15, %c0_16], %16 {strides = array<i32>} : memref<512x64xf32, #tpu.memory_space<vmem>>, vector<512x64xf32>,
    %c0_17 = arith.constant 0 : index
    %c0_18 = arith.constant 0 : index
    %18 = vector.load %arg10[%c0_17, %c0_18] : memref<224x32xf32, #tpu.memory_space<vmem>>, vector<224x16xf32>
    %19 = vector.shape_cast %18 : vector<224x16xf32> to vector<4x56x16xf32>
    %c0_19 = arith.constant 0 : index
    %c0_20 = arith.constant 0 : index
    %20 = vector.load %arg11[%c0_19, %c0_20] : memref<512x64xf32, #tpu.memory_space<vmem>>, vector<512x16xf32>
    %21 = vector.shape_cast %20 : vector<512x16xf32> to vector<4x128x16xf32>
    %c0_21 = arith.constant 0 : index
    %c32_22 = arith.constant 32 : index
    %22 = vector.load %arg11[%c0_21, %c32_22] : memref<512x64xf32, #tpu.memory_space<vmem>>, vector<512x16xf32>
    %23 = vector.shape_cast %22 : vector<512x16xf32> to vector<4x128x16xf32>
    %24 = arith.truncf %19 : vector<4x56x16xf32> to vector<4x56x16xbf16>
    %25 = arith.truncf %21 : vector<4x128x16xf32> to vector<4x128x16xbf16>
    %cst_23 = arith.constant dense<0.000000e+00> : vector<4x56x128xf32>
    %26 = tpu.matmul %24, %25, %cst_23 {dimension_numbers = #tpu.dot_dimension_numbers<[2], [2], [1], [1], [0, 0, 0, 1, 1, 1], [0], [0]>} : vector<4x56x16xbf16>, vector<4x128x16xbf16>, vector<4x56x128xf32> -> vector<4x56x128xf32>
    %c0_24 = arith.constant 0 : index
    %c0_25 = arith.constant 0 : index
    %c0_26 = arith.constant 0 : index
    %27 = vector.load %arg7[%c0_24, %c0_25, %c0_26] : memref<2x56x128xf32, #tpu.memory_space<vmem>>, vector<1x56x128xf32>
    %28 = vector.shape_cast %27 : vector<1x56x128xf32> to vector<56x128xf32>
    %29 = vector.shape_cast %28 : vector<56x128xf32> to vector<1x56x128xf32>
    %30 = vector.broadcast %29 : vector<1x56x128xf32> to vector<4x56x128xf32>
    %31 = arith.addf %26, %30 : vector<4x56x128xf32>
    %c0_27 = arith.constant 0 : index
    %c0_28 = arith.constant 0 : index
    %c0_29 = arith.constant 0 : index
    %32 = vector.load %arg8[%c0_27, %c0_28, %c0_29] : memref<4x56x128xf32, #tpu.memory_space<vmem>>, vector<4x56x128xf32>
    %33 = arith.addf %31, %32 : vector<4x56x128xf32>
    %cst_30 = arith.constant dense<0xFF800000> : vector<4x56xf32>
    %34 = vector.multi_reduction <maximumf>, %33, %cst_30 [2] : vector<4x56x128xf32> to vector<4x56xf32>
    %35 = vector.shape_cast %34 : vector<4x56xf32> to vector<4x56x1xf32>
    %36 = vector.broadcast %35 : vector<4x56x1xf32> to vector<4x56x128xf32>
    %37 = arith.subf %33, %36 : vector<4x56x128xf32>
    %38 = math.exp %37 : vector<4x56x128xf32>
    %cst_31 = arith.constant dense<0.000000e+00> : vector<4x56xf32>
    %39 = vector.multi_reduction <add>, %38, %cst_31 [2] : vector<4x56x128xf32> to vector<4x56xf32>
    %40 = vector.shape_cast %39 : vector<4x56xf32> to vector<4x56x1xf32>
    %41 = tpu.reciprocal %40 {approx = true} : vector<4x56x1xf32> -> vector<4x56x1xf32>
    %42 = vector.broadcast %41 : vector<4x56x1xf32> to vector<4x56x128xf32>
    %43 = arith.mulf %38, %42 : vector<4x56x128xf32>
    %44 = arith.truncf %43 : vector<4x56x128xf32> to vector<4x56x128xbf16>
    %45 = arith.truncf %23 : vector<4x128x16xf32> to vector<4x128x16xbf16>
    %cst_32 = arith.constant dense<0.000000e+00> : vector<4x56x16xf32>
    %46 = tpu.matmul %44, %45, %cst_32 {dimension_numbers = #tpu.dot_dimension_numbers<[2], [1], [1], [2], [0, 0, 0, 1, 1, 2], [0], [0]>} : vector<4x56x128xbf16>, vector<4x128x16xbf16>, vector<4x56x16xf32> -> vector<4x56x16xf32>
    %47 = vector.shape_cast %46 : vector<4x56x16xf32> to vector<224x16xf32>
    %c0_33 = arith.constant 0 : index
    %c0_34 = arith.constant 0 : index
    %48 = vector.load %arg12[%c0_33, %c0_34] : memref<224x32xf32, #tpu.memory_space<vmem>>, vector<224x16xf32>
    tpu.vector_store %arg12[%c0_33, %c0_34], %47 {strides = array<i32>} : memref<224x32xf32, #tpu.memory_space<vmem>>, vector<224x16xf32>,
    %c0_35 = arith.constant 0 : index
    %c16 = arith.constant 16 : index
    %49 = vector.load %arg10[%c0_35, %c16] : memref<224x32xf32, #tpu.memory_space<vmem>>, vector<224x16xf32>
    %50 = vector.shape_cast %49 : vector<224x16xf32> to vector<4x56x16xf32>
    %c0_36 = arith.constant 0 : index
    %c16_37 = arith.constant 16 : index
    %51 = vector.load %arg11[%c0_36, %c16_37] : memref<512x64xf32, #tpu.memory_space<vmem>>, vector<512x16xf32>
    %52 = vector.shape_cast %51 : vector<512x16xf32> to vector<4x128x16xf32>
    %c0_38 = arith.constant 0 : index
    %c48 = arith.constant 48 : index
    %53 = vector.load %arg11[%c0_38, %c48] : memref<512x64xf32, #tpu.memory_space<vmem>>, vector<512x16xf32>
    %54 = vector.shape_cast %53 : vector<512x16xf32> to vector<4x128x16xf32>
    %55 = arith.truncf %50 : vector<4x56x16xf32> to vector<4x56x16xbf16>
    %56 = arith.truncf %52 : vector<4x128x16xf32> to vector<4x128x16xbf16>
    %cst_39 = arith.constant dense<0.000000e+00> : vector<4x56x128xf32>
    %57 = tpu.matmul %55, %56, %cst_39 {dimension_numbers = #tpu.dot_dimension_numbers<[2], [2], [1], [1], [0, 0, 0, 1, 1, 1], [0], [0]>} : vector<4x56x16xbf16>, vector<4x128x16xbf16>, vector<4x56x128xf32> -> vector<4x56x128xf32>
    %c1 = arith.constant 1 : index
    %c0_40 = arith.constant 0 : index
    %c0_41 = arith.constant 0 : index
    %58 = vector.load %arg7[%c1, %c0_40, %c0_41] : memref<2x56x128xf32, #tpu.memory_space<vmem>>, vector<1x56x128xf32>
    %59 = vector.shape_cast %58 : vector<1x56x128xf32> to vector<56x128xf32>
    %60 = vector.shape_cast %59 : vector<56x128xf32> to vector<1x56x128xf32>
    %61 = vector.broadcast %60 : vector<1x56x128xf32> to vector<4x56x128xf32>
    %62 = arith.addf %57, %61 : vector<4x56x128xf32>
    %c0_42 = arith.constant 0 : index
    %c0_43 = arith.constant 0 : index
    %c0_44 = arith.constant 0 : index
    %63 = vector.load %arg8[%c0_42, %c0_43, %c0_44] : memref<4x56x128xf32, #tpu.memory_space<vmem>>, vector<4x56x128xf32>
    %64 = arith.addf %62, %63 : vector<4x56x128xf32>
    %cst_45 = arith.constant dense<0xFF800000> : vector<4x56xf32>
    %65 = vector.multi_reduction <maximumf>, %64, %cst_45 [2] : vector<4x56x128xf32> to vector<4x56xf32>
    %66 = vector.shape_cast %65 : vector<4x56xf32> to vector<4x56x1xf32>
    %67 = vector.broadcast %66 : vector<4x56x1xf32> to vector<4x56x128xf32>
    %68 = arith.subf %64, %67 : vector<4x56x128xf32>
    %69 = math.exp %68 : vector<4x56x128xf32>
    %cst_46 = arith.constant dense<0.000000e+00> : vector<4x56xf32>
    %70 = vector.multi_reduction <add>, %69, %cst_46 [2] : vector<4x56x128xf32> to vector<4x56xf32>
    %71 = vector.shape_cast %70 : vector<4x56xf32> to vector<4x56x1xf32>
    %72 = tpu.reciprocal %71 {approx = true} : vector<4x56x1xf32> -> vector<4x56x1xf32>
    %73 = vector.broadcast %72 : vector<4x56x1xf32> to vector<4x56x128xf32>
    %74 = arith.mulf %69, %73 : vector<4x56x128xf32>
    %75 = arith.truncf %74 : vector<4x56x128xf32> to vector<4x56x128xbf16>
    %76 = arith.truncf %54 : vector<4x128x16xf32> to vector<4x128x16xbf16>
    %cst_47 = arith.constant dense<0.000000e+00> : vector<4x56x16xf32>
    %77 = tpu.matmul %75, %76, %cst_47 {dimension_numbers = #tpu.dot_dimension_numbers<[2], [1], [1], [2], [0, 0, 0, 1, 1, 2], [0], [0]>} : vector<4x56x128xbf16>, vector<4x128x16xbf16>, vector<4x56x16xf32> -> vector<4x56x16xf32>
    %78 = vector.shape_cast %77 : vector<4x56x16xf32> to vector<224x16xf32>
    %c0_48 = arith.constant 0 : index
    %c16_49 = arith.constant 16 : index
    %79 = vector.load %arg12[%c0_48, %c16_49] : memref<224x32xf32, #tpu.memory_space<vmem>>, vector<224x16xf32>
    tpu.vector_store %arg12[%c0_48, %c16_49], %78 {strides = array<i32>} : memref<224x32xf32, #tpu.memory_space<vmem>>, vector<224x16xf32>,
    %c0_50 = arith.constant 0 : index
    %c0_51 = arith.constant 0 : index
    %80 = vector.load %arg12[%c0_50, %c0_51] : memref<224x32xf32, #tpu.memory_space<vmem>>, vector<224x32xf32>
    %81 = arith.truncf %80 : vector<224x32xf32> to vector<224x32xbf16>
    %c0_52 = arith.constant 0 : index
    %c0_53 = arith.constant 0 : index
    %82 = vector.load %arg5[%c0_52, %c0_53] : memref<32x32xbf16, #tpu.memory_space<vmem>>, vector<32x32xbf16>
    %cst_54 = arith.constant dense<0.000000e+00> : vector<224x32xf32>
    %83 = tpu.matmul %81, %82, %cst_54 {dimension_numbers = #tpu.dot_dimension_numbers<[1], [0], [0], [1], [0, 0, 1, 1], [], []>} : vector<224x32xbf16>, vector<32x32xbf16>, vector<224x32xf32> -> vector<224x32xf32>
    %c0_55 = arith.constant 0 : index
    %c0_56 = arith.constant 0 : index
    %84 = vector.load %arg6[%c0_55, %c0_56] : memref<1x32xf32, #tpu.memory_space<vmem>>, vector<1x32xf32>
    %85 = vector.broadcast %84 : vector<1x32xf32> to vector<224x32xf32>
    %86 = arith.addf %83, %85 : vector<224x32xf32>
    %c0_57 = arith.constant 0 : index
    %c0_58 = arith.constant 0 : index
    %c0_59 = arith.constant 0 : index
    %87 = vector.load %arg9[%c0_57, %c0_58, %c0_59] : memref<1x224x32xf32, #tpu.memory_space<vmem>>, vector<1x224x32xf32>
    %88 = vector.shape_cast %87 : vector<1x224x32xf32> to vector<224x32xf32>
    %89 = vector.shape_cast %86 : vector<224x32xf32> to vector<1x224x32xf32>
    tpu.vector_store %arg9[%c0_57, %c0_58, %c0_59], %89 {strides = array<i32>} : memref<1x224x32xf32, #tpu.memory_space<vmem>>, vector<1x224x32xf32>,
    return
  }
  func.func @transform_0(%arg0: i32) -> (i32, i32, i32) {
    %c0_i32 = arith.constant 0 : i32
    %c0_i32_0 = arith.constant 0 : i32
    %c0_i32_1 = arith.constant 0 : i32
    return %arg0, %c0_i32, %c0_i32_0 : i32, i32, i32
  }
  func.func @transform_1(%arg0: i32) -> (i32, i32, i32) {
    %c0_i32 = arith.constant 0 : i32
    %c0_i32_0 = arith.constant 0 : i32
    %c0_i32_1 = arith.constant 0 : i32
    return %arg0, %c0_i32, %c0_i32_0 : i32, i32, i32
  }
  func.func @transform_2(%arg0: i32) -> (i32, i32) {
    %c0_i32 = arith.constant 0 : i32
    %c0_i32_0 = arith.constant 0 : i32
    %c0_i32_1 = arith.constant 0 : i32
    return %c0_i32, %c0_i32_0 : i32, i32
  }
  func.func @transform_3(%arg0: i32) -> (i32, i32) {
    %c0_i32 = arith.constant 0 : i32
    %c0_i32_0 = arith.constant 0 : i32
    %c0_i32_1 = arith.constant 0 : i32
    return %c0_i32, %c0_i32_0 : i32, i32
  }
  func.func @transform_4(%arg0: i32) -> (i32, i32) {
    %c0_i32 = arith.constant 0 : i32
    %c0_i32_0 = arith.constant 0 : i32
    %c0_i32_1 = arith.constant 0 : i32
    return %c0_i32, %c0_i32_0 : i32, i32
  }
  func.func @transform_5(%arg0: i32) -> (i32, i32) {
    %c0_i32 = arith.constant 0 : i32
    %c0_i32_0 = arith.constant 0 : i32
    %c0_i32_1 = arith.constant 0 : i32
    return %c0_i32, %c0_i32_0 : i32, i32
  }
  func.func @transform_6(%arg0: i32) -> (i32, i32, i32) {
    %c0_i32 = arith.constant 0 : i32
    %c0_i32_0 = arith.constant 0 : i32
    %c0_i32_1 = arith.constant 0 : i32
    %c0_i32_2 = arith.constant 0 : i32
    return %c0_i32, %c0_i32_0, %c0_i32_1 : i32, i32, i32
  }
  func.func @transform_7(%arg0: i32) -> (i32, i32, i32) {
    %c0_i32 = arith.constant 0 : i32
    %c0_i32_0 = arith.constant 0 : i32
    %c0_i32_1 = arith.constant 0 : i32
    %c0_i32_2 = arith.constant 0 : i32
    return %c0_i32, %c0_i32_0, %c0_i32_1 : i32, i32, i32
  }
  func.func @transform_8(%arg0: i32) -> (i32, i32, i32) {
    %c0_i32 = arith.constant 0 : i32
    %c0_i32_0 = arith.constant 0 : i32
    %c0_i32_1 = arith.constant 0 : i32
    return %arg0, %c0_i32, %c0_i32_0 : i32, i32, i32
  }
}

</mosaic_0001>

<bundles_post_ra>
// kernel: tile.9
= control target key start
LH: loop header
LB: loop body
LE: loop exit
PB: predicated region body
PF: predicated region fallthrough
CT: control target
= control target key end

     0   :  { %vm492_vm0 = vcmask 1047556   ;;  %s1466_s10 = smov 49   ;;  %s1786_s2 = smov 3  ;;  %vm494_vm1 = vcmask 400384   ;;  %vm681_vm2 = vcmask 802184   ;;  %s2059_s0 = inlined_call_operand.vmem [shape: f32[2,49,2,49], index: 0, kind: input, shape index: {}]   ;;  %s2060_s1 = inlined_call_operand.vmem [shape: f32[2,49,98], index: 1, kind: output, shape index: {}]  }
   0x1   :  { %v1410_v0 = vld [vmem:[%s2059_s0 + $0xe] sm:$0x3]  ;;  %v1411_v1 = vld [vmem:[%s2059_s0 + $0xc] sm:$0x3]  ;;  %v1412_v2 = vld [vmem:[%s2059_s0 + $0xa] sm:$0x3] }
   0x2   :  { %458 = vst [vmem:[#allocation1 + $0x38] sm:$0x3] %v1410_v0  ;;  %463 = vst [vmem:[#allocation1 + $0x30] sm:$0x3] %v1411_v1  ;;  %v1413_v3 = vld [vmem:[%s2059_s0 + $0x8] sm:$0x3] }
   0x3   :  { %468 = vst [vmem:[#allocation1 + $0x28] sm:$0x3] %v1412_v2  ;;  %v1414_v4 = vld [vmem:[%s2059_s0 + $0x6] sm:$0x3]  ;;  %v1415_v5 = vld [vmem:[%s2059_s0 + $0x4] sm:$0x3] }
   0x4   :  { %473 = vst [vmem:[#allocation1 + $0x20] sm:$0x3] %v1413_v3  ;;  %478 = vst [vmem:[#allocation1 + $0x18] sm:$0x3] %v1414_v4  ;;  %v1416_v6 = vld [vmem:[%s2059_s0 + $0x2] sm:$0x3] }
   0x5   :  { %483 = vst [vmem:[#allocation1 + $0x10] sm:$0x3] %v1415_v5  ;;  %v488_v7 = vld [vmem:[%s2059_s0] sm:$0x3]  ;;  %487 = vst [vmem:[#allocation1 + $0x8] sm:$0x3] %v1416_v6 }
   0x6   :  { %489 = vst [vmem:[#allocation1] sm:$0x3] %v488_v7  ;;  %v1402_v8 = vld [vmem:[%s2059_s0 + $0x1e] sm:$0x3]  ;;  %v1403_v9 = vld [vmem:[%s2059_s0 + $0x1c] sm:$0x3] }
   0x7   :  { %v1404_v10 = vld [vmem:[%s2059_s0 + $0x1a] sm:$0x3]  ;;  %418 = vst [vmem:[#allocation1 + $0x78] sm:$0x3] %v1402_v8  ;;  %423 = vst [vmem:[#allocation1 + $0x70] sm:$0x3] %v1403_v9 }
   0x8   :  { %428 = vst [vmem:[#allocation1 + $0x68] sm:$0x3] %v1404_v10  ;;  %v1405_v11 = vld [vmem:[%s2059_s0 + $0x18] sm:$0x3]  ;;  %v1406_v12 = vld [vmem:[%s2059_s0 + $0x16] sm:$0x3] }
   0x9   :  { %v1407_v13 = vld [vmem:[%s2059_s0 + $0x14] sm:$0x3]  ;;  %433 = vst [vmem:[#allocation1 + $0x60] sm:$0x3] %v1405_v11  ;;  %438 = vst [vmem:[#allocation1 + $0x58] sm:$0x3] %v1406_v12 }
   0xa   :  { %443 = vst [vmem:[#allocation1 + $0x50] sm:$0x3] %v1407_v13  ;;  %v1408_v14 = vld [vmem:[%s2059_s0 + $0x12] sm:$0x3]  ;;  %v1409_v15 = vld [vmem:[%s2059_s0 + $0x10] sm:$0x3] }
   0xb   :  { %v1394_v16 = vld [vmem:[%s2059_s0 + $0x2e] sm:$0x3]  ;;  %448 = vst [vmem:[#allocation1 + $0x48] sm:$0x3] %v1408_v14  ;;  %453 = vst [vmem:[#allocation1 + $0x40] sm:$0x3] %v1409_v15 }
   0xc   :  { %378 = vst [vmem:[#allocation1 + $0xb8] sm:$0x3] %v1394_v16  ;;  %v1395_v17 = vld [vmem:[%s2059_s0 + $0x2c] sm:$0x3]  ;;  %v1396_v18 = vld [vmem:[%s2059_s0 + $0x2a] sm:$0x3] }
   0xd   :  { %v1397_v19 = vld [vmem:[%s2059_s0 + $0x28] sm:$0x3]  ;;  %383 = vst [vmem:[#allocation1 + $0xb0] sm:$0x3] %v1395_v17  ;;  %388 = vst [vmem:[#allocation1 + $0xa8] sm:$0x3] %v1396_v18 }
   0xe   :  { %393 = vst [vmem:[#allocation1 + $0xa0] sm:$0x3] %v1397_v19  ;;  %v1398_v20 = vld [vmem:[%s2059_s0 + $0x26] sm:$0x3]  ;;  %v1399_v21 = vld [vmem:[%s2059_s0 + $0x24] sm:$0x3] }
   0xf   :  { %v1400_v22 = vld [vmem:[%s2059_s0 + $0x22] sm:$0x3]  ;;  %398 = vst [vmem:[#allocation1 + $0x98] sm:$0x3] %v1398_v20  ;;  %403 = vst [vmem:[#allocation1 + $0x90] sm:$0x3] %v1399_v21 }
  0x10   :  { %408 = vst [vmem:[#allocation1 + $0x88] sm:$0x3] %v1400_v22  ;;  %v1401_v23 = vld [vmem:[%s2059_s0 + $0x20] sm:$0x3]  ;;  %v1386_v24 = vld [vmem:[%s2059_s0 + $0x3e] sm:$0x3] }
  0x11   :  { %v1387_v25 = vld [vmem:[%s2059_s0 + $0x3c] sm:$0x3]  ;;  %v676_v26 = vld [vmem:[#allocation1 + $0x1] ss:$8 sm:$0xf0]  }
  0x12   :  { %413 = vst [vmem:[#allocation1 + $0x80] sm:$0x3] %v1401_v23  ;;  %338 = vst [vmem:[#allocation1 + $0xf8] sm:$0x3] %v1386_v24  ;;  %v1388_v27 = vld [vmem:[%s2059_s0 + $0x3a] sm:$0x3] }
  0x13   :  { %343 = vst [vmem:[#allocation1 + $0xf0] sm:$0x3] %v1387_v25  ;;  %v674_v28 = vld [vmem:[#allocation1 + $0x1] ss:$8 sm:$0xf]  }
  0x14   :  { %348 = vst [vmem:[#allocation1 + $0xe8] sm:$0x3] %v1388_v27  ;;  %v1389_v29 = vld [vmem:[%s2059_s0 + $0x38] sm:$0x3]  ;;  %v678_v30 = vsel %vm492_vm0, %v676_v26, %v674_v28  ;;  %v1390_v31 = vld [vmem:[%s2059_s0 + $0x36] sm:$0x3] }
  0x15   :  { %353 = vst [vmem:[#allocation1 + $0xe0] sm:$0x3] %v1389_v29  ;;  %v1391_v32 = vld [vmem:[%s2059_s0 + $0x34] sm:$0x3]  ;;  %v1392_v33 = vld [vmem:[%s2059_s0 + $0x32] sm:$0x3]  ;;  %679 = vrot.lane.b32.xlu0 %v678_v30, %s1466_s10 }
  0x16   :  { %v692_v34 = vld [vmem:[#allocation1 + $0x41] ss:$8 sm:$0xf0]   ;;  %358 = vst [vmem:[#allocation1 + $0xd8] sm:$0x3] %v1390_v31 }
  0x17   :  { %363 = vst [vmem:[#allocation1 + $0xd0] sm:$0x3] %v1391_v32  ;;  %368 = vst [vmem:[#allocation1 + $0xc8] sm:$0x3] %v1392_v33  ;;  %v1393_v35 = vld [vmem:[%s2059_s0 + $0x30] sm:$0x3] }
  0x18   :  { %v690_v36 = vld [vmem:[#allocation1 + $0x41] ss:$8 sm:$0xf]   ;;  %373 = vst [vmem:[#allocation1 + $0xc0] sm:$0x3] %v1393_v35 }
  0x19   :  { %v1378_v37 = vld [vmem:[%s2059_s0 + $0x4e] sm:$0x3]  ;;  %v694_v38 = vsel %vm492_vm0, %v692_v34, %v690_v36  ;;  %v709_v39 = vld [vmem:[#allocation1 + $0x81] ss:$8 sm:$0xf0]  }
  0x1a   :  { %298 = vst [vmem:[#allocation1 + $0x138] sm:$0x3] %v1378_v37  ;;  %v1379_v40 = vld [vmem:[%s2059_s0 + $0x4c] sm:$0x3]  ;;  %v1380_v41 = vld [vmem:[%s2059_s0 + $0x4a] sm:$0x3]  ;;  %695 = vrot.lane.b32.xlu0 %v694_v38, %s1466_s10 }
  0x1b   :  { %303 = vst [vmem:[#allocation1 + $0x130] sm:$0x3] %v1379_v40  ;;  %v1381_v42 = vld [vmem:[%s2059_s0 + $0x48] sm:$0x3]  ;;  %v1382_v43 = vld [vmem:[%s2059_s0 + $0x46] sm:$0x3] }
  0x1c   :  { %v707_v44 = vld [vmem:[#allocation1 + $0x81] ss:$8 sm:$0xf]   ;;  %308 = vst [vmem:[#allocation1 + $0x128] sm:$0x3] %v1380_v41 }
  0x1d   :  { %313 = vst [vmem:[#allocation1 + $0x120] sm:$0x3] %v1381_v42  ;;  %318 = vst [vmem:[#allocation1 + $0x118] sm:$0x3] %v1382_v43  ;;  %v1383_v45 = vld [vmem:[%s2059_s0 + $0x44] sm:$0x3]  ;;  %v711_v46 = vsel %vm492_vm0, %v709_v39, %v707_v44 }
  0x1e   :  { %323 = vst [vmem:[#allocation1 + $0x110] sm:$0x3] %v1383_v45  ;;  %v1384_v47 = vld [vmem:[%s2059_s0 + $0x42] sm:$0x3]  ;;  %v1385_v48 = vld [vmem:[%s2059_s0 + $0x40] sm:$0x3]  ;;  %712 = vrot.lane.b32.xlu1 %v711_v46, %s1466_s10 }
  0x1f   :  { %v1370_v49 = vld [vmem:[%s2059_s0 + $0x5e] sm:$0x3]  ;;  %v726_v50 = vld [vmem:[#allocation1 + $0xc1] ss:$8 sm:$0xf0]  }
  0x20   :  { %328 = vst [vmem:[#allocation1 + $0x108] sm:$0x3] %v1384_v47  ;;  %333 = vst [vmem:[#allocation1 + $0x100] sm:$0x3] %v1385_v48  ;;  %v1371_v51 = vld [vmem:[%s2059_s0 + $0x5c] sm:$0x3] }
  0x21   :  { %258 = vst [vmem:[#allocation1 + $0x178] sm:$0x3] %v1370_v49  ;;  %263 = vst [vmem:[#allocation1 + $0x170] sm:$0x3] %v1371_v51  ;;  %v1372_v52 = vld [vmem:[%s2059_s0 + $0x5a] sm:$0x3] }
  0x22   :  { %v1373_v53 = vld [vmem:[%s2059_s0 + $0x58] sm:$0x3]  ;;  %v1374_v54 = vld [vmem:[%s2059_s0 + $0x56] sm:$0x3]  ;;  %268 = vst [vmem:[#allocation1 + $0x168] sm:$0x3] %v1372_v52 }
  0x23   :  { %v724_v55 = vld [vmem:[#allocation1 + $0xc1] ss:$8 sm:$0xf]   ;;  %273 = vst [vmem:[#allocation1 + $0x160] sm:$0x3] %v1373_v53 }
  0x24   :  { %278 = vst [vmem:[#allocation1 + $0x158] sm:$0x3] %v1374_v54  ;;  %v1375_v56 = vld [vmem:[%s2059_s0 + $0x54] sm:$0x3]  ;;  %v728_v57 = vsel %vm492_vm0, %v726_v50, %v724_v55  ;;  %v1376_v58 = vld [vmem:[%s2059_s0 + $0x52] sm:$0x3] }
  0x25   :  { %283 = vst [vmem:[#allocation1 + $0x150] sm:$0x3] %v1375_v56  ;;  %v1377_v59 = vld [vmem:[%s2059_s0 + $0x50] sm:$0x3]  ;;  %v1362_v60 = vld [vmem:[%s2059_s0 + $0x6e] sm:$0x3]  ;;  %729 = vrot.lane.b32.xlu1 %v728_v57, %s1466_s10 }
  0x26   :  { %288 = vst [vmem:[#allocation1 + $0x148] sm:$0x3] %v1376_v58  ;;  %293 = vst [vmem:[#allocation1 + $0x140] sm:$0x3] %v1377_v59  ;;  %v1363_v61 = vld [vmem:[%s2059_s0 + $0x6c] sm:$0x3] }
  0x27   :  { %218 = vst [vmem:[#allocation1 + $0x1b8] sm:$0x3] %v1362_v60  ;;  %v1364_v62 = vld [vmem:[%s2059_s0 + $0x6a] sm:$0x3]  ;;  %v1365_v63 = vld [vmem:[%s2059_s0 + $0x68] sm:$0x3] }
  0x28   :  { %v743_v0 = vld [vmem:[#allocation1 + $0x101] ss:$8 sm:$0xf0]   ;;  %223 = vst [vmem:[#allocation1 + $0x1b0] sm:$0x3] %v1363_v61 }
  0x29   :  { %228 = vst [vmem:[#allocation1 + $0x1a8] sm:$0x3] %v1364_v62  ;;  %233 = vst [vmem:[#allocation1 + $0x1a0] sm:$0x3] %v1365_v63  ;;  %v1366_v1 = vld [vmem:[%s2059_s0 + $0x66] sm:$0x3] }
  0x2a   :  { %238 = vst [vmem:[#allocation1 + $0x198] sm:$0x3] %v1366_v1  ;;  %v1367_v2 = vld [vmem:[%s2059_s0 + $0x64] sm:$0x3]  ;;  %v1368_v3 = vld [vmem:[%s2059_s0 + $0x62] sm:$0x3] }
  0x2b   :  { %v1369_v4 = vld [vmem:[%s2059_s0 + $0x60] sm:$0x3]  ;;  %243 = vst [vmem:[#allocation1 + $0x190] sm:$0x3] %v1367_v2  ;;  %248 = vst [vmem:[#allocation1 + $0x188] sm:$0x3] %v1368_v3 }
  0x2c   :  { %v741_v5 = vld [vmem:[#allocation1 + $0x101] ss:$8 sm:$0xf]   ;;  %253 = vst [vmem:[#allocation1 + $0x180] sm:$0x3] %v1369_v4 }
  0x2d   :  { %v1354_v6 = vld [vmem:[%s2059_s0 + $0x7e] sm:$0x3]  ;;  %v745_v7 = vsel %vm492_vm0, %v743_v0, %v741_v5  ;;  %v1355_v8 = vld [vmem:[%s2059_s0 + $0x7c] sm:$0x3]  ;;  %v1356_v9 = vld [vmem:[%s2059_s0 + $0x7a] sm:$0x3] }
  0x2e   :  { %178 = vst [vmem:[#allocation1 + $0x1f8] sm:$0x3] %v1354_v6  ;;  %v1357_v10 = vld [vmem:[%s2059_s0 + $0x78] sm:$0x3]  ;;  %746 = vrot.lane.b32.xlu0 %v745_v7, %s1466_s10  ;;  %183 = vst [vmem:[#allocation1 + $0x1f0] sm:$0x3] %v1355_v8 }
  0x2f   :  { %v760_v11 = vld [vmem:[#allocation1 + $0x141] ss:$8 sm:$0xf0]   ;;  %188 = vst [vmem:[#allocation1 + $0x1e8] sm:$0x3] %v1356_v9 }
  0x30   :  { %193 = vst [vmem:[#allocation1 + $0x1e0] sm:$0x3] %v1357_v10  ;;  %v1358_v12 = vld [vmem:[%s2059_s0 + $0x76] sm:$0x3]  ;;  %v1359_v13 = vld [vmem:[%s2059_s0 + $0x74] sm:$0x3] }
  0x31   :  { %198 = vst [vmem:[#allocation1 + $0x1d8] sm:$0x3] %v1358_v12  ;;  %v1360_v14 = vld [vmem:[%s2059_s0 + $0x72] sm:$0x3]  ;;  %v1361_v15 = vld [vmem:[%s2059_s0 + $0x70] sm:$0x3] }
  0x32   :  { %v758_v16 = vld [vmem:[#allocation1 + $0x141] ss:$8 sm:$0xf]   ;;  %203 = vst [vmem:[#allocation1 + $0x1d0] sm:$0x3] %v1359_v13 }
  0x33   :  { %208 = vst [vmem:[#allocation1 + $0x1c8] sm:$0x3] %v1360_v14  ;;  %213 = vst [vmem:[#allocation1 + $0x1c0] sm:$0x3] %v1361_v15  ;;  %v1346_v17 = vld [vmem:[%s2059_s0 + $0x8e] sm:$0x3]  ;;  %v762_v18 = vsel %vm492_vm0, %v760_v11, %v758_v16 }
  0x34   :  { %v777_v19 = vld [vmem:[#allocation1 + $0x181] ss:$8 sm:$0xf0]   ;;  %138 = vst [vmem:[#allocation1 + $0x238] sm:$0x3] %v1346_v17  ;;  %763 = vrot.lane.b32.xlu1 %v762_v18, %s1466_s10 }
  0x35   :  { %v1347_v20 = vld [vmem:[%s2059_s0 + $0x8c] sm:$0x3]  ;;  %v1348_v21 = vld [vmem:[%s2059_s0 + $0x8a] sm:$0x3]  ;;  %v1349_v22 = vld [vmem:[%s2059_s0 + $0x88] sm:$0x3] }
  0x36   :  { %143 = vst [vmem:[#allocation1 + $0x230] sm:$0x3] %v1347_v20  ;;  %v1350_v23 = vld [vmem:[%s2059_s0 + $0x86] sm:$0x3]  ;;  %148 = vst [vmem:[#allocation1 + $0x228] sm:$0x3] %v1348_v21 }
  0x37   :  { %v775_v24 = vld [vmem:[#allocation1 + $0x181] ss:$8 sm:$0xf]   ;;  %153 = vst [vmem:[#allocation1 + $0x220] sm:$0x3] %v1349_v22 }
  0x38   :  { %158 = vst [vmem:[#allocation1 + $0x218] sm:$0x3] %v1350_v23  ;;  %v1351_v25 = vld [vmem:[%s2059_s0 + $0x84] sm:$0x3]  ;;  %v779_v26 = vsel %vm492_vm0, %v777_v19, %v775_v24  ;;  %v1352_v27 = vld [vmem:[%s2059_s0 + $0x82] sm:$0x3] }
  0x39   :  { %163 = vst [vmem:[#allocation1 + $0x210] sm:$0x3] %v1351_v25  ;;  %v1353_v28 = vld [vmem:[%s2059_s0 + $0x80] sm:$0x3]  ;;  %v1338_v29 = vld [vmem:[%s2059_s0 + $0x9e] sm:$0x3]  ;;  %780 = vrot.lane.b32.xlu0 %v779_v26, %s1466_s10 }
  0x3a   :  { %v794_v30 = vld [vmem:[#allocation1 + $0x1c1] ss:$8 sm:$0xf0]   ;;  %168 = vst [vmem:[#allocation1 + $0x208] sm:$0x3] %v1352_v27 }
  0x3b   :  { %173 = vst [vmem:[#allocation1 + $0x200] sm:$0x3] %v1353_v28  ;;  %98 = vst [vmem:[#allocation1 + $0x278] sm:$0x3] %v1338_v29  ;;  %v1339_v31 = vld [vmem:[%s2059_s0 + $0x9c] sm:$0x3] }
  0x3c   :  { %103 = vst [vmem:[#allocation1 + $0x270] sm:$0x3] %v1339_v31  ;;  %v1340_v32 = vld [vmem:[%s2059_s0 + $0x9a] sm:$0x3]  ;;  %v1341_v33 = vld [vmem:[%s2059_s0 + $0x98] sm:$0x3] }
  0x3d   :  { %v1342_v34 = vld [vmem:[%s2059_s0 + $0x96] sm:$0x3]  ;;  %v792_v35 = vld [vmem:[#allocation1 + $0x1c1] ss:$8 sm:$0xf]  }
  0x3e   :  { %108 = vst [vmem:[#allocation1 + $0x268] sm:$0x3] %v1340_v32  ;;  %113 = vst [vmem:[#allocation1 + $0x260] sm:$0x3] %v1341_v33  ;;  %v1343_v36 = vld [vmem:[%s2059_s0 + $0x94] sm:$0x3]  ;;  %v796_v37 = vsel %vm492_vm0, %v794_v30, %v792_v35 }
  0x3f   :  { %118 = vst [vmem:[#allocation1 + $0x258] sm:$0x3] %v1342_v34  ;;  %123 = vst [vmem:[#allocation1 + $0x250] sm:$0x3] %v1343_v36  ;;  %v1344_v38 = vld [vmem:[%s2059_s0 + $0x92] sm:$0x3]  ;;  %797 = vrot.lane.b32.xlu1 %v796_v37, %s1466_s10 }
  0x40   :  { %v1345_v39 = vld [vmem:[%s2059_s0 + $0x90] sm:$0x3]  ;;  %v1330_v40 = vld [vmem:[%s2059_s0 + $0xae] sm:$0x3]  ;;  %128 = vst [vmem:[#allocation1 + $0x248] sm:$0x3] %v1344_v38 }
  0x41   :  { %133 = vst [vmem:[#allocation1 + $0x240] sm:$0x3] %v1345_v39  ;;  %58 = vst [vmem:[#allocation1 + $0x2b8] sm:$0x3] %v1330_v40  ;;  %v1331_v41 = vld [vmem:[%s2059_s0 + $0xac] sm:$0x3] }
  0x42   :  { %v1332_v42 = vld [vmem:[%s2059_s0 + $0xaa] sm:$0x3]  ;;  %v1333_v43 = vld [vmem:[%s2059_s0 + $0xa8] sm:$0x3]  ;;  %63 = vst [vmem:[#allocation1 + $0x2b0] sm:$0x3] %v1331_v41 }
  0x43   :  { %v811_v44 = vld [vmem:[#allocation1 + $0x201] ss:$8 sm:$0xf0]   ;;  %68 = vst [vmem:[#allocation1 + $0x2a8] sm:$0x3] %v1332_v42 }
  0x44   :  { %73 = vst [vmem:[#allocation1 + $0x2a0] sm:$0x3] %v1333_v43  ;;  %v1334_v45 = vld [vmem:[%s2059_s0 + $0xa6] sm:$0x3]  ;;  %v1335_v46 = vld [vmem:[%s2059_s0 + $0xa4] sm:$0x3] }
  0x45   :  { %78 = vst [vmem:[#allocation1 + $0x298] sm:$0x3] %v1334_v45  ;;  %v1336_v47 = vld [vmem:[%s2059_s0 + $0xa2] sm:$0x3]  ;;  %v1337_v48 = vld [vmem:[%s2059_s0 + $0xa0] sm:$0x3] }
  0x46   :  { %v809_v49 = vld [vmem:[#allocation1 + $0x201] ss:$8 sm:$0xf]   ;;  %83 = vst [vmem:[#allocation1 + $0x290] sm:$0x3] %v1335_v46 }
  0x47   :  { %88 = vst [vmem:[#allocation1 + $0x288] sm:$0x3] %v1336_v47  ;;  %93 = vst [vmem:[#allocation1 + $0x280] sm:$0x3] %v1337_v48  ;;  %v1322_v50 = vld [vmem:[%s2059_s0 + $0xbe] sm:$0x3]  ;;  %v813_v51 = vsel %vm492_vm0, %v811_v44, %v809_v49 }
  0x48   :  { %18 = vst [vmem:[#allocation1 + $0x2f8] sm:$0x3] %v1322_v50  ;;  %v1323_v52 = vld [vmem:[%s2059_s0 + $0xbc] sm:$0x3]  ;;  %v1324_v53 = vld [vmem:[%s2059_s0 + $0xba] sm:$0x3]  ;;  %814 = vrot.lane.b32.xlu0 %v813_v51, %s1466_s10 }
  0x49   :  { %v1325_v54 = vld [vmem:[%s2059_s0 + $0xb8] sm:$0x3]  ;;  %23 = vst [vmem:[#allocation1 + $0x2f0] sm:$0x3] %v1323_v52  ;;  %28 = vst [vmem:[#allocation1 + $0x2e8] sm:$0x3] %v1324_v53 }
  0x4a   :  { %v828_v55 = vld [vmem:[#allocation1 + $0x241] ss:$8 sm:$0xf0]   ;;  %33 = vst [vmem:[#allocation1 + $0x2e0] sm:$0x3] %v1325_v54 }
  0x4b   :  { %v1326_v56 = vld [vmem:[%s2059_s0 + $0xb6] sm:$0x3]  ;;  %v1327_v57 = vld [vmem:[%s2059_s0 + $0xb4] sm:$0x3]  ;;  %v1328_v58 = vld [vmem:[%s2059_s0 + $0xb2] sm:$0x3] }
  0x4c   :  { %38 = vst [vmem:[#allocation1 + $0x2d8] sm:$0x3] %v1326_v56  ;;  %v1329_v59 = vld [vmem:[%s2059_s0 + $0xb0] sm:$0x3]  ;;  %43 = vst [vmem:[#allocation1 + $0x2d0] sm:$0x3] %v1327_v57 }
  0x4d   :  { %v826_v60 = vld [vmem:[#allocation1 + $0x241] ss:$8 sm:$0xf]   ;;  %48 = vst [vmem:[#allocation1 + $0x2c8] sm:$0x3] %v1328_v58 }
  0x4e   :  { %53 = vst [vmem:[#allocation1 + $0x2c0] sm:$0x3] %v1329_v59  ;;  %v1320_v61 = vld [vmem:[%s2059_s0 + $0xc2] sm:$0x3]  ;;  %v830_v62 = vsel %vm492_vm0, %v828_v55, %v826_v60  ;;  %v1321_v0 = vld [vmem:[%s2059_s0 + $0xc0] sm:$0x3] }
  0x4f   :  { %v845_v63 = vld [vmem:[#allocation1 + $0x281] ss:$8 sm:$0xf0]   ;;  %8 = vst [vmem:[#allocation1 + $0x308] sm:$0x3] %v1320_v61  ;;  %831 = vrot.lane.b32.xlu1 %v830_v62, %s1466_s10  ;;  %s1819_s0 = smov 3 }
  0x50   :  { %13 = vst [vmem:[#allocation1 + $0x300] sm:$0x3] %v1321_v0  ;;  %v490_v1 = vld [vmem:[#allocation1] ss:$8 sm:$0xf]  }
  0x51   :  { %v491_v2 = vld [vmem:[#allocation1] ss:$8 sm:$0xf0]   ;;  %v843_v3 = vld [vmem:[#allocation1 + $0x281] ss:$8 sm:$0xf]  }
  0x52   :  { %v493_v4 = vsel %vm492_vm0, %v491_v2, %v490_v1  ;;  %v503_v5 = vld [vmem:[#allocation1 + $0x40] ss:$8 sm:$0xf]   ;;  %v847_v6 = vsel %vm492_vm0, %v845_v63, %v843_v3  ;;  %v862_v9 = vld [vmem:[#allocation1 + $0x2c1] ss:$8 sm:$0xf0]  }
  0x53   :  { %495 = vst.msk [vmem:[#allocation0] sm:$0x3] %vm494_vm1, %v493_v4   ;;  %497 = vst.msk [vmem:[#allocation0 + $0x6] sm:$0xc] %vm494_vm1, %v493_v4   ;;  %848 = vrot.lane.b32.xlu0 %v847_v6, %s1466_s10 }
  0x54   :  { %499 = vst.msk [vmem:[#allocation0 + $0xc] sm:$0x30] %vm494_vm1, %v493_v4   ;;  %501 = vst.msk [vmem:[#allocation0 + $0x12] sm:$0xc0] %vm494_vm1, %v493_v4  }
  0x55   :  { %v505_v7 = vld [vmem:[#allocation1 + $0x40] ss:$8 sm:$0xf0]   ;;  %v860_v15 = vld [vmem:[#allocation1 + $0x2c1] ss:$8 sm:$0xf]  }
  0x56   :  { %v518_v8 = vld [vmem:[#allocation1 + $0x80] ss:$8 sm:$0xf]   ;;  %v507_v10 = vsel %vm492_vm0, %v505_v7, %v503_v5  ;;  %v864_v18 = vsel %vm492_vm0, %v862_v9, %v860_v15 }
  0x57   :  { %v520_v11 = vld [vmem:[#allocation1 + $0x80] ss:$8 sm:$0xf0]   ;;  %510 = vst.msk [vmem:[#allocation0 + $0x20] sm:$0x3] %vm494_vm1, %v507_v10   ;;  %865 = vrot.lane.b32.xlu1 %v864_v18, %s1466_s10 }
  0x58   :  { %512 = vst.msk [vmem:[#allocation0 + $0x26] sm:$0xc] %vm494_vm1, %v507_v10   ;;  %514 = vst.msk [vmem:[#allocation0 + $0x2c] sm:$0x30] %vm494_vm1, %v507_v10   ;;  %v522_v12 = vsel %vm492_vm0, %v520_v11, %v518_v8  ;;  %v878_v21 = vld [vmem:[#allocation1 + $0x301] ss:$8 sm:%s1786_s2]  }
  0x59   :  { %516 = vst.msk [vmem:[#allocation0 + $0x32] sm:$0xc0] %vm494_vm1, %v507_v10   ;;  %v533_v13 = vld [vmem:[#allocation1 + $0xc0] ss:$8 sm:$0xf]   ;;  %879 = vrot.lane.b32.xlu0 %v878_v21, %s1466_s10 }
  0x5a   :  { %v535_v14 = vld [vmem:[#allocation1 + $0xc0] ss:$8 sm:$0xf0]   ;;  %525 = vst.msk [vmem:[#allocation0 + $0x40] sm:$0x3] %vm494_vm1, %v522_v12  }
  0x5b   :  { %527 = vst.msk [vmem:[#allocation0 + $0x46] sm:$0xc] %vm494_vm1, %v522_v12   ;;  %529 = vst.msk [vmem:[#allocation0 + $0x4c] sm:$0x30] %vm494_vm1, %v522_v12   ;;  %v537_v16 = vsel %vm492_vm0, %v535_v14, %v533_v13  ;;  %v669_v43 = vld [vmem:[#allocation1 + $0x300] ss:$8 sm:%s1819_s0]  }
  0x5c   :  { %531 = vst.msk [vmem:[#allocation0 + $0x52] sm:$0xc0] %vm494_vm1, %v522_v12   ;;  %v548_v17 = vld [vmem:[#allocation1 + $0x100] ss:$8 sm:$0xf]  }
  0x5d   :  { %540 = vst.msk [vmem:[#allocation0 + $0x60] sm:$0x3] %vm494_vm1, %v537_v16   ;;  %542 = vst.msk [vmem:[#allocation0 + $0x66] sm:$0xc] %vm494_vm1, %v537_v16  }
  0x5e   :  { %544 = vst.msk [vmem:[#allocation0 + $0x6c] sm:$0x30] %vm494_vm1, %v537_v16   ;;  %546 = vst.msk [vmem:[#allocation0 + $0x72] sm:$0xc0] %vm494_vm1, %v537_v16  }
  0x5f   :  { %v550_v19 = vld [vmem:[#allocation1 + $0x100] ss:$8 sm:$0xf0]   ;;  %672 = vst.msk [vmem:[#allocation0 + $0x180] sm:$0x3] %vm494_vm1, %v669_v43  }
  0x60   :  { %v563_v20 = vld [vmem:[#allocation1 + $0x140] ss:$8 sm:$0xf]   ;;  %v552_v22 = vsel %vm492_vm0, %v550_v19, %v548_v17 }
  0x61   :  { %v565_v23 = vld [vmem:[#allocation1 + $0x140] ss:$8 sm:$0xf0]   ;;  %555 = vst.msk [vmem:[#allocation0 + $0x80] sm:$0x3] %vm494_vm1, %v552_v22  }
  0x62   :  { %557 = vst.msk [vmem:[#allocation0 + $0x86] sm:$0xc] %vm494_vm1, %v552_v22   ;;  %559 = vst.msk [vmem:[#allocation0 + $0x8c] sm:$0x30] %vm494_vm1, %v552_v22   ;;  %v567_v24 = vsel %vm492_vm0, %v565_v23, %v563_v20 }
  0x63   :  { %561 = vst.msk [vmem:[#allocation0 + $0x92] sm:$0xc0] %vm494_vm1, %v552_v22   ;;  %v578_v25 = vld [vmem:[#allocation1 + $0x180] ss:$8 sm:$0xf]  }
  0x64   :  { %v580_v26 = vld [vmem:[#allocation1 + $0x180] ss:$8 sm:$0xf0]   ;;  %570 = vst.msk [vmem:[#allocation0 + $0xa0] sm:$0x3] %vm494_vm1, %v567_v24  }
  0x65   :  { %572 = vst.msk [vmem:[#allocation0 + $0xa6] sm:$0xc] %vm494_vm1, %v567_v24   ;;  %574 = vst.msk [vmem:[#allocation0 + $0xac] sm:$0x30] %vm494_vm1, %v567_v24   ;;  %v582_v27 = vsel %vm492_vm0, %v580_v26, %v578_v25 }
  0x66   :  { %576 = vst.msk [vmem:[#allocation0 + $0xb2] sm:$0xc0] %vm494_vm1, %v567_v24   ;;  %v593_v28 = vld [vmem:[#allocation1 + $0x1c0] ss:$8 sm:$0xf]  }
  0x67   :  { %v595_v29 = vld [vmem:[#allocation1 + $0x1c0] ss:$8 sm:$0xf0]   ;;  %585 = vst.msk [vmem:[#allocation0 + $0xc0] sm:$0x3] %vm494_vm1, %v582_v27  }
  0x68   :  { %587 = vst.msk [vmem:[#allocation0 + $0xc6] sm:$0xc] %vm494_vm1, %v582_v27   ;;  %589 = vst.msk [vmem:[#allocation0 + $0xcc] sm:$0x30] %vm494_vm1, %v582_v27   ;;  %v597_v30 = vsel %vm492_vm0, %v595_v29, %v593_v28 }
  0x69   :  { %591 = vst.msk [vmem:[#allocation0 + $0xd2] sm:$0xc0] %vm494_vm1, %v582_v27   ;;  %v608_v31 = vld [vmem:[#allocation1 + $0x200] ss:$8 sm:$0xf]  }
  0x6a   :  { %v610_v32 = vld [vmem:[#allocation1 + $0x200] ss:$8 sm:$0xf0]   ;;  %600 = vst.msk [vmem:[#allocation0 + $0xe0] sm:$0x3] %vm494_vm1, %v597_v30  }
  0x6b   :  { %602 = vst.msk [vmem:[#allocation0 + $0xe6] sm:$0xc] %vm494_vm1, %v597_v30   ;;  %604 = vst.msk [vmem:[#allocation0 + $0xec] sm:$0x30] %vm494_vm1, %v597_v30   ;;  %v612_v33 = vsel %vm492_vm0, %v610_v32, %v608_v31 }
  0x6c   :  { %606 = vst.msk [vmem:[#allocation0 + $0xf2] sm:$0xc0] %vm494_vm1, %v597_v30   ;;  %v623_v34 = vld [vmem:[#allocation1 + $0x240] ss:$8 sm:$0xf]  }
  0x6d   :  { %v625_v35 = vld [vmem:[#allocation1 + $0x240] ss:$8 sm:$0xf0]   ;;  %615 = vst.msk [vmem:[#allocation0 + $0x100] sm:$0x3] %vm494_vm1, %v612_v33  }
  0x6e   :  { %617 = vst.msk [vmem:[#allocation0 + $0x106] sm:$0xc] %vm494_vm1, %v612_v33   ;;  %619 = vst.msk [vmem:[#allocation0 + $0x10c] sm:$0x30] %vm494_vm1, %v612_v33   ;;  %v627_v36 = vsel %vm492_vm0, %v625_v35, %v623_v34 }
  0x6f   :  { %621 = vst.msk [vmem:[#allocation0 + $0x112] sm:$0xc0] %vm494_vm1, %v612_v33   ;;  %v638_v37 = vld [vmem:[#allocation1 + $0x280] ss:$8 sm:$0xf]  }
  0x70   :  { %v640_v38 = vld [vmem:[#allocation1 + $0x280] ss:$8 sm:$0xf0]   ;;  %630 = vst.msk [vmem:[#allocation0 + $0x120] sm:$0x3] %vm494_vm1, %v627_v36  }
  0x71   :  { %632 = vst.msk [vmem:[#allocation0 + $0x126] sm:$0xc] %vm494_vm1, %v627_v36   ;;  %634 = vst.msk [vmem:[#allocation0 + $0x12c] sm:$0x30] %vm494_vm1, %v627_v36   ;;  %v642_v39 = vsel %vm492_vm0, %v640_v38, %v638_v37 }
  0x72   :  { %636 = vst.msk [vmem:[#allocation0 + $0x132] sm:$0xc0] %vm494_vm1, %v627_v36   ;;  %v653_v40 = vld [vmem:[#allocation1 + $0x2c0] ss:$8 sm:$0xf]  }
  0x73   :  { %v655_v41 = vld [vmem:[#allocation1 + $0x2c0] ss:$8 sm:$0xf0]   ;;  %645 = vst.msk [vmem:[#allocation0 + $0x140] sm:$0x3] %vm494_vm1, %v642_v39  }
  0x74   :  { %647 = vst.msk [vmem:[#allocation0 + $0x146] sm:$0xc] %vm494_vm1, %v642_v39   ;;  %649 = vst.msk [vmem:[#allocation0 + $0x14c] sm:$0x30] %vm494_vm1, %v642_v39   ;;  %v657_v42 = vsel %vm492_vm0, %v655_v41, %v653_v40 }
  0x75   :  { %651 = vst.msk [vmem:[#allocation0 + $0x152] sm:$0xc0] %vm494_vm1, %v642_v39   ;;  %660 = vst.msk [vmem:[#allocation0 + $0x160] sm:$0x3] %vm494_vm1, %v657_v42  }
  0x76   :  { %662 = vst.msk [vmem:[#allocation0 + $0x166] sm:$0xc] %vm494_vm1, %v657_v42   ;;  %664 = vst.msk [vmem:[#allocation0 + $0x16c] sm:$0x30] %vm494_vm1, %v657_v42  }
  0x77   :  { %666 = vst.msk [vmem:[#allocation0 + $0x172] sm:$0xc0] %vm494_vm1, %v657_v42  }
  0x87   :  { %v680_v44 = vpop.permute.xlu0 %679  }
  0x88   :  { %682 = vst.msk [vmem:[#allocation0] sm:$0x3] %vm681_vm2, %v680_v44   ;;  %684 = vst.msk [vmem:[#allocation0 + $0x6] sm:$0xc] %vm681_vm2, %v680_v44  }
  0x89   :  { %686 = vst.msk [vmem:[#allocation0 + $0xc] sm:$0x30] %vm681_vm2, %v680_v44   ;;  %688 = vst.msk [vmem:[#allocation0 + $0x12] sm:$0xc0] %vm681_vm2, %v680_v44  }
  0x8c   :  { %v696_v45 = vpop.permute.xlu0 %695  }
  0x8d   :  { %699 = vst.msk [vmem:[#allocation0 + $0x20] sm:$0x3] %vm681_vm2, %v696_v45   ;;  %701 = vst.msk [vmem:[#allocation0 + $0x26] sm:$0xc] %vm681_vm2, %v696_v45  }
  0x8e   :  { %703 = vst.msk [vmem:[#allocation0 + $0x2c] sm:$0x30] %vm681_vm2, %v696_v45   ;;  %705 = vst.msk [vmem:[#allocation0 + $0x32] sm:$0xc0] %vm681_vm2, %v696_v45  }
  0x8f   :  { %v887_v47 = vld [vmem:[#allocation0] sm:$0x3]  ;;  %v891_v48 = vld [vmem:[#allocation0 + $0x8] sm:$0x3] }
  0x90   :  { %v713_v46 = vpop.permute.xlu1 %712   ;;  %v896_v49 = vld [vmem:[#allocation0 + $0x10] sm:$0x3]  ;;  %889 = vst [vmem:[%s2060_s1] sm:$0x3] %v887_v47  ;;  %1417 = vst [vmem:[%s2060_s1 + $0x2] sm:$0x3] %v891_v48 }
  0x91   :  { %716 = vst.msk [vmem:[#allocation0 + $0x40] sm:$0x3] %vm681_vm2, %v713_v46   ;;  %718 = vst.msk [vmem:[#allocation0 + $0x46] sm:$0xc] %vm681_vm2, %v713_v46   ;;  %v902_v50 = vld [vmem:[#allocation0 + $0x18] sm:$0x3] }
  0x92   :  { %720 = vst.msk [vmem:[#allocation0 + $0x4c] sm:$0x30] %vm681_vm2, %v713_v46   ;;  %722 = vst.msk [vmem:[#allocation0 + $0x52] sm:$0xc0] %vm681_vm2, %v713_v46  }
  0x93   :  { %1418 = vst [vmem:[%s2060_s1 + $0x4] sm:$0x3] %v896_v49  ;;  %1419 = vst [vmem:[%s2060_s1 + $0x6] sm:$0x3] %v902_v50 }
  0x94   :  { %v908_v52 = vld [vmem:[#allocation0 + $0x20] sm:$0x3]  ;;  %v914_v53 = vld [vmem:[#allocation0 + $0x28] sm:$0x3] }
  0x95   :  { %v920_v54 = vld [vmem:[#allocation0 + $0x30] sm:$0x3]  ;;  %1420 = vst [vmem:[%s2060_s1 + $0x8] sm:$0x3] %v908_v52  ;;  %1421 = vst [vmem:[%s2060_s1 + $0xa] sm:$0x3] %v914_v53 }
  0x96   :  { %1422 = vst [vmem:[%s2060_s1 + $0xc] sm:$0x3] %v920_v54  ;;  %v926_v55 = vld [vmem:[#allocation0 + $0x38] sm:$0x3] }
  0x97   :  { %v730_v51 = vpop.permute.xlu1 %729   ;;  %1423 = vst [vmem:[%s2060_s1 + $0xe] sm:$0x3] %v926_v55 }
  0x98   :  { %733 = vst.msk [vmem:[#allocation0 + $0x60] sm:$0x3] %vm681_vm2, %v730_v51   ;;  %735 = vst.msk [vmem:[#allocation0 + $0x66] sm:$0xc] %vm681_vm2, %v730_v51   ;;  %v932_v56 = vld [vmem:[#allocation0 + $0x40] sm:$0x3] }
  0x99   :  { %737 = vst.msk [vmem:[#allocation0 + $0x6c] sm:$0x30] %vm681_vm2, %v730_v51   ;;  %739 = vst.msk [vmem:[#allocation0 + $0x72] sm:$0xc0] %vm681_vm2, %v730_v51   ;;  %v938_v57 = vld [vmem:[#allocation0 + $0x48] sm:$0x3] }
  0x9a   :  { %v944_v58 = vld [vmem:[#allocation0 + $0x50] sm:$0x3]  ;;  %1424 = vst [vmem:[%s2060_s1 + $0x10] sm:$0x3] %v932_v56  ;;  %1425 = vst [vmem:[%s2060_s1 + $0x12] sm:$0x3] %v938_v57 }
  0x9b   :  { %1426 = vst [vmem:[%s2060_s1 + $0x14] sm:$0x3] %v944_v58  ;;  %v950_v59 = vld [vmem:[#allocation0 + $0x58] sm:$0x3] }
  0x9c   :  { %1427 = vst [vmem:[%s2060_s1 + $0x16] sm:$0x3] %v950_v59 }
  0x9f   :  { %v956_v61 = vld [vmem:[#allocation0 + $0x60] sm:$0x3]  ;;  %v962_v62 = vld [vmem:[#allocation0 + $0x68] sm:$0x3] }
  0xa0   :  { %v747_v60 = vpop.permute.xlu0 %746   ;;  %v968_v63 = vld [vmem:[#allocation0 + $0x70] sm:$0x3]  ;;  %1428 = vst [vmem:[%s2060_s1 + $0x18] sm:$0x3] %v956_v61  ;;  %1429 = vst [vmem:[%s2060_s1 + $0x1a] sm:$0x3] %v962_v62 }
  0xa1   :  { %750 = vst.msk [vmem:[#allocation0 + $0x80] sm:$0x3] %vm681_vm2, %v747_v60   ;;  %752 = vst.msk [vmem:[#allocation0 + $0x86] sm:$0xc] %vm681_vm2, %v747_v60   ;;  %v974_v0 = vld [vmem:[#allocation0 + $0x78] sm:$0x3] }
  0xa2   :  { %754 = vst.msk [vmem:[#allocation0 + $0x8c] sm:$0x30] %vm681_vm2, %v747_v60   ;;  %756 = vst.msk [vmem:[#allocation0 + $0x92] sm:$0xc0] %vm681_vm2, %v747_v60  }
  0xa3   :  { %1430 = vst [vmem:[%s2060_s1 + $0x1c] sm:$0x3] %v968_v63  ;;  %1431 = vst [vmem:[%s2060_s1 + $0x1e] sm:$0x3] %v974_v0 }
  0xa6   :  { %v764_v1 = vpop.permute.xlu1 %763  }
  0xa7   :  { %767 = vst.msk [vmem:[#allocation0 + $0xa0] sm:$0x3] %vm681_vm2, %v764_v1   ;;  %769 = vst.msk [vmem:[#allocation0 + $0xa6] sm:$0xc] %vm681_vm2, %v764_v1  }
  0xa8   :  { %771 = vst.msk [vmem:[#allocation0 + $0xac] sm:$0x30] %vm681_vm2, %v764_v1   ;;  %773 = vst.msk [vmem:[#allocation0 + $0xb2] sm:$0xc0] %vm681_vm2, %v764_v1   ;;  %v980_v3 = vld [vmem:[#allocation0 + $0x80] sm:$0x3] }
  0xa9   :  { %v986_v4 = vld [vmem:[#allocation0 + $0x88] sm:$0x3]  ;;  %v992_v5 = vld [vmem:[#allocation0 + $0x90] sm:$0x3]  ;;  %1432 = vst [vmem:[%s2060_s1 + $0x20] sm:$0x3] %v980_v3 }
  0xaa   :  { %1433 = vst [vmem:[%s2060_s1 + $0x22] sm:$0x3] %v986_v4  ;;  %1434 = vst [vmem:[%s2060_s1 + $0x24] sm:$0x3] %v992_v5  ;;  %v998_v6 = vld [vmem:[#allocation0 + $0x98] sm:$0x3] }
  0xab   :  { %v781_v2 = vpop.permute.xlu0 %780   ;;  %1435 = vst [vmem:[%s2060_s1 + $0x26] sm:$0x3] %v998_v6 }
  0xac   :  { %784 = vst.msk [vmem:[#allocation0 + $0xc0] sm:$0x3] %vm681_vm2, %v781_v2   ;;  %786 = vst.msk [vmem:[#allocation0 + $0xc6] sm:$0xc] %vm681_vm2, %v781_v2  }
  0xad   :  { %788 = vst.msk [vmem:[#allocation0 + $0xcc] sm:$0x30] %vm681_vm2, %v781_v2   ;;  %790 = vst.msk [vmem:[#allocation0 + $0xd2] sm:$0xc0] %vm681_vm2, %v781_v2  }
  0xae   :  { %v1004_v8 = vld [vmem:[#allocation0 + $0xa0] sm:$0x3]  ;;  %v1010_v9 = vld [vmem:[#allocation0 + $0xa8] sm:$0x3] }
  0xaf   :  { %v1016_v10 = vld [vmem:[#allocation0 + $0xb0] sm:$0x3]  ;;  %1436 = vst [vmem:[%s2060_s1 + $0x28] sm:$0x3] %v1004_v8  ;;  %1437 = vst [vmem:[%s2060_s1 + $0x2a] sm:$0x3] %v1010_v9 }
  0xb0   :  { %1438 = vst [vmem:[%s2060_s1 + $0x2c] sm:$0x3] %v1016_v10  ;;  %v1022_v11 = vld [vmem:[#allocation0 + $0xb8] sm:$0x3] }
  0xb1   :  { %v798_v7 = vpop.permute.xlu1 %797   ;;  %1439 = vst [vmem:[%s2060_s1 + $0x2e] sm:$0x3] %v1022_v11 }
  0xb2   :  { %801 = vst.msk [vmem:[#allocation0 + $0xe0] sm:$0x3] %vm681_vm2, %v798_v7   ;;  %803 = vst.msk [vmem:[#allocation0 + $0xe6] sm:$0xc] %vm681_vm2, %v798_v7  }
  0xb3   :  { %805 = vst.msk [vmem:[#allocation0 + $0xec] sm:$0x30] %vm681_vm2, %v798_v7   ;;  %807 = vst.msk [vmem:[#allocation0 + $0xf2] sm:$0xc0] %vm681_vm2, %v798_v7   ;;  %v1028_v12 = vld [vmem:[#allocation0 + $0xc0] sm:$0x3] }
  0xb4   :  { %v1034_v13 = vld [vmem:[#allocation0 + $0xc8] sm:$0x3]  ;;  %v1040_v14 = vld [vmem:[#allocation0 + $0xd0] sm:$0x3]  ;;  %1440 = vst [vmem:[%s2060_s1 + $0x30] sm:$0x3] %v1028_v12 }
  0xb5   :  { %1441 = vst [vmem:[%s2060_s1 + $0x32] sm:$0x3] %v1034_v13  ;;  %1442 = vst [vmem:[%s2060_s1 + $0x34] sm:$0x3] %v1040_v14  ;;  %v1046_v15 = vld [vmem:[#allocation0 + $0xd8] sm:$0x3] }
  0xb6   :  { %1443 = vst [vmem:[%s2060_s1 + $0x36] sm:$0x3] %v1046_v15 }
  0xb9   :  { %v1052_v17 = vld [vmem:[#allocation0 + $0xe0] sm:$0x3]  ;;  %v1058_v18 = vld [vmem:[#allocation0 + $0xe8] sm:$0x3] }
  0xba   :  { %v815_v16 = vpop.permute.xlu0 %814   ;;  %v1064_v19 = vld [vmem:[#allocation0 + $0xf0] sm:$0x3]  ;;  %1444 = vst [vmem:[%s2060_s1 + $0x38] sm:$0x3] %v1052_v17  ;;  %1445 = vst [vmem:[%s2060_s1 + $0x3a] sm:$0x3] %v1058_v18 }
  0xbb   :  { %818 = vst.msk [vmem:[#allocation0 + $0x100] sm:$0x3] %vm681_vm2, %v815_v16   ;;  %820 = vst.msk [vmem:[#allocation0 + $0x106] sm:$0xc] %vm681_vm2, %v815_v16   ;;  %v1070_v20 = vld [vmem:[#allocation0 + $0xf8] sm:$0x3] }
  0xbc   :  { %822 = vst.msk [vmem:[#allocation0 + $0x10c] sm:$0x30] %vm681_vm2, %v815_v16   ;;  %824 = vst.msk [vmem:[#allocation0 + $0x112] sm:$0xc0] %vm681_vm2, %v815_v16  }
  0xbd   :  { %1446 = vst [vmem:[%s2060_s1 + $0x3c] sm:$0x3] %v1064_v19  ;;  %1447 = vst [vmem:[%s2060_s1 + $0x3e] sm:$0x3] %v1070_v20 }
  0xc1   :  { %v832_v21 = vpop.permute.xlu1 %831  }
  0xc2   :  { %835 = vst.msk [vmem:[#allocation0 + $0x120] sm:$0x3] %vm681_vm2, %v832_v21   ;;  %837 = vst.msk [vmem:[#allocation0 + $0x126] sm:$0xc] %vm681_vm2, %v832_v21   ;;  %v1076_v23 = vld [vmem:[#allocation0 + $0x100] sm:$0x3] }
  0xc3   :  { %839 = vst.msk [vmem:[#allocation0 + $0x12c] sm:$0x30] %vm681_vm2, %v832_v21   ;;  %841 = vst.msk [vmem:[#allocation0 + $0x132] sm:$0xc0] %vm681_vm2, %v832_v21   ;;  %v1082_v24 = vld [vmem:[#allocation0 + $0x108] sm:$0x3] }
  0xc4   :  { %v1088_v25 = vld [vmem:[#allocation0 + $0x110] sm:$0x3]  ;;  %1448 = vst [vmem:[%s2060_s1 + $0x40] sm:$0x3] %v1076_v23  ;;  %1449 = vst [vmem:[%s2060_s1 + $0x42] sm:$0x3] %v1082_v24 }
  0xc5   :  { %v849_v22 = vpop.permute.xlu0 %848   ;;  %1450 = vst [vmem:[%s2060_s1 + $0x44] sm:$0x3] %v1088_v25  ;;  %v1094_v26 = vld [vmem:[#allocation0 + $0x118] sm:$0x3] }
  0xc6   :  { %852 = vst.msk [vmem:[#allocation0 + $0x140] sm:$0x3] %vm681_vm2, %v849_v22   ;;  %854 = vst.msk [vmem:[#allocation0 + $0x146] sm:$0xc] %vm681_vm2, %v849_v22  }
  0xc7   :  { %856 = vst.msk [vmem:[#allocation0 + $0x14c] sm:$0x30] %vm681_vm2, %v849_v22   ;;  %858 = vst.msk [vmem:[#allocation0 + $0x152] sm:$0xc0] %vm681_vm2, %v849_v22  }
  0xc8   :  { %1451 = vst [vmem:[%s2060_s1 + $0x46] sm:$0x3] %v1094_v26 }
  0xc9   :  { %v866_v27 = vpop.permute.xlu1 %865   ;;  %v1100_v28 = vld [vmem:[#allocation0 + $0x120] sm:$0x3]  ;;  %v1106_v29 = vld [vmem:[#allocation0 + $0x128] sm:$0x3] }
  0xca   :  { %v1112_v30 = vld [vmem:[#allocation0 + $0x130] sm:$0x3]  ;;  %869 = vst.msk [vmem:[#allocation0 + $0x160] sm:$0x3] %vm681_vm2, %v866_v27   ;;  %871 = vst.msk [vmem:[#allocation0 + $0x166] sm:$0xc] %vm681_vm2, %v866_v27  }
  0xcb   :  { %873 = vst.msk [vmem:[#allocation0 + $0x16c] sm:$0x30] %vm681_vm2, %v866_v27   ;;  %875 = vst.msk [vmem:[#allocation0 + $0x172] sm:$0xc0] %vm681_vm2, %v866_v27   ;;  %v880_v31 = vpop.permute.xlu0 %879   ;;  %v1118_v32 = vld [vmem:[#allocation0 + $0x138] sm:$0x3] }
  0xcc   :  { %1452 = vst [vmem:[%s2060_s1 + $0x48] sm:$0x3] %v1100_v28  ;;  %1453 = vst [vmem:[%s2060_s1 + $0x4a] sm:$0x3] %v1106_v29 }
  0xcd   :  { %1454 = vst [vmem:[%s2060_s1 + $0x4c] sm:$0x3] %v1112_v30  ;;  %883 = vst.msk [vmem:[#allocation0 + $0x180] sm:$0x3] %vm681_vm2, %v880_v31   ;;  %v1124_v33 = vld [vmem:[#allocation0 + $0x140] sm:$0x3] }
  0xce   :  { %1455 = vst [vmem:[%s2060_s1 + $0x4e] sm:$0x3] %v1118_v32  ;;  %v1130_v34 = vld [vmem:[#allocation0 + $0x148] sm:$0x3]  ;;  %v1136_v35 = vld [vmem:[#allocation0 + $0x150] sm:$0x3] }
  0xcf   :  { %1456 = vst [vmem:[%s2060_s1 + $0x50] sm:$0x3] %v1124_v33  ;;  %1457 = vst [vmem:[%s2060_s1 + $0x52] sm:$0x3] %v1130_v34  ;;  %v1142_v36 = vld [vmem:[#allocation0 + $0x158] sm:$0x3] }
  0xd0   :  { %1458 = vst [vmem:[%s2060_s1 + $0x54] sm:$0x3] %v1136_v35  ;;  %1459 = vst [vmem:[%s2060_s1 + $0x56] sm:$0x3] %v1142_v36 }
  0xd1   :  { %v1148_v37 = vld [vmem:[#allocation0 + $0x160] sm:$0x3]  ;;  %v1154_v38 = vld [vmem:[#allocation0 + $0x168] sm:$0x3] }
  0xd2   :  { %v1160_v39 = vld [vmem:[#allocation0 + $0x170] sm:$0x3]  ;;  %1460 = vst [vmem:[%s2060_s1 + $0x58] sm:$0x3] %v1148_v37  ;;  %1461 = vst [vmem:[%s2060_s1 + $0x5a] sm:$0x3] %v1154_v38 }
  0xd3   :  { %1462 = vst [vmem:[%s2060_s1 + $0x5c] sm:$0x3] %v1160_v39  ;;  %v1166_v40 = vld [vmem:[#allocation0 + $0x178] sm:$0x3] }
  0xd4   :  { %v1172_v41 = vld [vmem:[#allocation0 + $0x180] sm:$0x3]  ;;  %1463 = vst [vmem:[%s2060_s1 + $0x5e] sm:$0x3] %v1166_v40 }
  0xd5   :  { %1464 = vst [vmem:[%s2060_s1 + $0x60] sm:$0x3] %v1172_v41 }

</bundles_post_ra>
